<compile_context>
chip_gen: v6e
topology: v6e:2x2x1
jax: 0.10.0
libtpu: 0.0.40
codegen_flags: <defaults>
</compile_context>

<pallas_src>
import jax
import jax.numpy as jnp
from jax.experimental import pallas as pl
from jax.experimental.pallas import tpu as pltpu

# Same padding constant as the PyTorch module (-2**32 + 1).
_NEG_PAD = float(-(2.0 ** 32) + 1.0)

# Safe across generations: above v5e/v6e scoped defaults (16/32 MiB), below
# v7x's 64 MiB physical VMEM.
_DEFAULT_VMEM_LIMIT = 48 * 1024 * 1024


def _attention_kernel(q_ref, keys_ref, len_ref, wt_ref, seg_ref, out_ref):
    """One grid step == one batch tile.

    q_ref   : (tb, Q)       queries (size-1 time dim squeezed in the wrapper)
    keys_ref: (tb, T*K)     lane-dense keys slab; column t*K + k == keys[b, t, k]
    len_ref : (tb, 1) i32   sequence lengths
    wt_ref  : (Q, T*K)      w^T tiled T times along columns (resident constant)
    seg_ref : (T*K, T)      0/1 segment-sum matrix, seg[t*K+k, t] = 1 (resident)
    out_ref : (T, tb)       softmax scores, transposed (lane axis = batch tile)
    """
    # Time-replicated query projection in one MXU matmul:
    #   qw_rep[b, t*K + k] = sum_q query[b, q] * w[k, q]
    q = q_ref[...].astype(jnp.float32)
    qw_rep = jnp.dot(q, wt_ref[...], preferred_element_type=jnp.float32)      # (tb, T*K)

    # Elementwise product on dense lanes (VPU), then the per-time-step reduction
    # as a second MXU matmul against the constant segment-sum matrix — never
    # materialises a lane-sparse (tb, T, K) temporary.
    prod = keys_ref[...].astype(jnp.float32) * qw_rep                          # (tb, T*K)
    att = jnp.dot(prod, seg_ref[...], preferred_element_type=jnp.float32)      # (tb, T)

    # Length mask: positions t >= seq_len[b] get the huge negative logit.
    t_idx = jax.lax.broadcasted_iota(jnp.int32, att.shape, 1)
    score = jnp.where(t_idx < len_ref[...], att, jnp.float32(_NEG_PAD))        # (tb, T)

    # Transpose the small (tb, T) logit tile so the wide batch-tile axis sits on
    # lanes: exp/mul touch ~16x fewer vregs and the final store is a dense,
    # unmasked vst instead of per-row masked partial stores.
    score_t = score.T                                                          # (T, tb)

    # Numerically-stable softmax over the sequence axis (axis 0 here == dim=1 in torch).
    m = jnp.max(score_t, axis=0, keepdims=True)
    e = jnp.exp(score_t - m)
    s = jnp.sum(e, axis=0, keepdims=True)
    # Reciprocal runs on the EUP (divide off the VPU).  approx=False keeps full
    # f32 parity with the reference; flip to approx=True for a bit more
    # throughput at ~1e-3 relative cost.
    out_ref[...] = (e * pl.reciprocal(s, approx=False)).astype(out_ref.dtype)


def _pick_batch_tile(B, per_row_bytes, resident_bytes, batch_tile, vmem_limit_bytes):
    """VMEM-budget-aware batch tile.  Tiles < B are multiples of 8 and divide B."""
    if batch_tile is not None:
        if B % batch_tile != 0:
            raise ValueError(f"batch_tile={batch_tile} must evenly divide batch={B}")
        if batch_tile != B and batch_tile % 8 != 0:
            raise ValueError(f"batch_tile={batch_tile} must be a multiple of 8 (or == batch)")
        return batch_tile

    # Working-set budget: ~2/3 of the scoped VMEM limit, minus the (double
    # buffered) resident weight/segment blocks, divided by per-row bytes
    # (double-buffered blocks + f32 intermediates).
    budget = (2 * vmem_limit_bytes) // 3 - 2 * resident_bytes
    tb_fit = max(8, budget // max(per_row_bytes, 1))

    if B <= 8 or B % 8 != 0:
        # Tiny / awkward batches run as one tile (block dims == full dims is
        # always a legal BlockSpec and one grid step has the least overhead).
        # Note: extreme T*K with a non-8-multiple batch would additionally need
        # sequence-axis tiling, which these DIEN shapes never require.
        return B

    cands = sorted((d for d in range(8, B + 1, 8) if B % d == 0 and d <= tb_fit),
                   reverse=True)
    # Prefer >= 2 grid steps so the "parallel" batch axis can shard across the
    # two TensorCores on v7x (no effect on single-TC v5e/v6e).
    for d in cands:
        if B // d >= 2:
            return d
    if cands:
        return cands[0]
    return 8


def attention_forward(query, keys, seq_len, w, *, batch_tile=None,
                      vmem_limit_bytes=_DEFAULT_VMEM_LIMIT):
    """query: [B, 1, Q], keys: [B, T, K], seq_len: [B, 1] int, w: [K, Q] -> scores [B, T] f32."""
    B, T, K = keys.shape
    Q = query.shape[-1]
    TK = T * K

    # Free wrapper-side re-layouts (no HBM transpose of the big activation):
    q2 = query.reshape(B, Q)                               # squeeze the size-1 time dim
    keys_flat = keys.reshape(B, TK)                        # lane-dense slab (contiguous reshape)
    len2 = seq_len.astype(jnp.int32).reshape(B, 1)

    # Tiny constants, resident in VMEM across all grid steps:
    w_t = jnp.transpose(w, (1, 0)).astype(jnp.float32)     # (Q, K)
    w_tiled = jnp.tile(w_t, (1, T))                        # (Q, T*K): projection replicated over time
    seg = ((jnp.arange(TK, dtype=jnp.int32) // K)[:, None]
           == jnp.arange(T, dtype=jnp.int32)[None, :]).astype(jnp.float32)   # (T*K, T)

    # Per-batch-row VMEM bytes: double-buffered q/keys/len/out blocks plus the
    # single-buffered f32 intermediates (qw_rep, prod) the compiler materialises.
    per_row = (2 * (Q * q2.dtype.itemsize + TK * keys_flat.dtype.itemsize + 4 + T * 4)
               + 2 * TK * 4)
    resident = (Q * TK + TK * T) * 4
    tb = _pick_batch_tile(B, per_row, resident, batch_tile, vmem_limit_bytes)
    nb = B // tb

    out_t = pl.pallas_call(
        _attention_kernel,
        out_shape=jax.ShapeDtypeStruct((nb, T, tb), jnp.float32),
        grid_spec=pltpu.PrefetchScalarGridSpec(
            num_scalar_prefetch=0,
            grid=(nb,),
            in_specs=[
                pl.BlockSpec((tb, Q), lambda b: (b, 0)),        # query
                pl.BlockSpec((tb, TK), lambda b: (b, 0)),       # keys (lane-dense)
                pl.BlockSpec((tb, 1), lambda b: (b, 0)),        # seq_len
                pl.BlockSpec((Q, TK), lambda b: (0, 0)),        # w^T tiled (resident)
                pl.BlockSpec((TK, T), lambda b: (0, 0)),        # segment-sum matrix (resident)
            ],
            out_specs=pl.BlockSpec((None, T, tb), lambda b: (b, 0, 0)),   # (T, tb) lane-dense
        ),
        compiler_params=pltpu.CompilerParams(
            dimension_semantics=("parallel",),                  # batch tiles are independent
            vmem_limit_bytes=vmem_limit_bytes,
        ),
    )(q2, keys_flat, len2, w_tiled, seg)

    # (nb, T, tb) -> (B, T): tiny wrapper-side relayout of the scores.
    return jnp.transpose(out_t, (0, 2, 1)).reshape(B, T)


def attention_reference(query, keys, seq_len, w):
    """Pure-JAX reference mirroring the PyTorch module (elementwise product + sum)."""
    B, T, K = keys.shape
    qw = query[:, 0, :] @ w.T                                   # [B, K]
    att = jnp.sum(keys * qw[:, None, :], axis=-1)               # [B, T]
    masks = jnp.arange(T, dtype=jnp.int32)[None, :] < seq_len.astype(jnp.int32)
    score = jnp.where(masks, att, jnp.float32(_NEG_PAD))
    return jax.nn.softmax(score, axis=1)


if __name__ == "__main__":
    # Small shapes consistent with the module: batch=8, max_seq_len=8, keys_dim=16, query_dim=32.
    B, T, K, Q = 8, 8, 16, 32

    key = jax.random.PRNGKey(0)
    k_q, k_k, k_w = jax.random.split(key, 3)

    query = jax.random.normal(k_q, (B, 1, Q), dtype=jnp.float32)
    keys = jax.random.normal(k_k, (B, T, K), dtype=jnp.float32)
    # Includes a seq_len == 0 row: it degenerates to a uniform 1/T distribution,
    # exactly like the PyTorch module (softmax of the constant -2^32+1 fill).
    seq_len = jnp.array([[8], [5], [3], [1], [0], [7], [2], [6]], dtype=jnp.int32)

    std = (2.0 / (K + Q)) ** 0.5          # xavier-normal-ish init for w: [keys_dim, query_dim]
    w = std * jax.random.normal(k_w, (K, Q), dtype=jnp.float32)

    out = attention_forward(query, keys, seq_len, w)
    out = jax.block_until_ready(out)

    ref = attention_reference(query, keys, seq_len, w)
    assert out.shape == (B, T)
    assert jnp.allclose(out, ref, atol=1e-4, rtol=1e-4), "Pallas Attention mismatch vs JAX reference"
    # Each row of softmax scores sums to 1 (uniform 1/T for the seq_len==0 row).
    assert jnp.allclose(jnp.sum(out, axis=1), jnp.ones((B,)), atol=1e-4)

    print("KERNEL_OK")
</pallas_src>

<mosaic_0001>
module attributes {stable_mosaic.version = 11 : i64} {
  func.func @_attention_kernel(%arg0: i32, %arg1: memref<8x32xf32, #tpu.memory_space<vmem>>, %arg2: memref<8x128xf32, #tpu.memory_space<vmem>>, %arg3: memref<8x1xi32, #tpu.memory_space<vmem>>, %arg4: memref<32x128xf32, #tpu.memory_space<vmem>>, %arg5: memref<128x8xf32, #tpu.memory_space<vmem>>, %arg6: memref<1x8x8xf32, #tpu.memory_space<vmem>>) attributes {dimension_semantics = [#tpu.dimension_semantics<parallel>], iteration_bounds = array<i64: 1>, scalar_prefetch = 0 : i64, scratch_operands = 0 : i64, tpu.core_type = #tpu.core_type<tc>, window_params = [{transform_indices = @transform_0, window_bounds = array<i64: 8, 32>}, {transform_indices = @transform_1, window_bounds = array<i64: 8, 128>}, {transform_indices = @transform_2, window_bounds = array<i64: 8, 1>}, {pipeline_mode = #tpu.pipeline_mode<synchronous>, transform_indices = @transform_3, window_bounds = array<i64: 32, 128>}, {pipeline_mode = #tpu.pipeline_mode<synchronous>, transform_indices = @transform_4, window_bounds = array<i64: 128, 8>}, {transform_indices = @transform_5, window_bounds = array<i64: 1, 8, 8>}]} {
    %c0 = arith.constant 0 : index
    %c0_0 = arith.constant 0 : index
    %0 = vector.load %arg1[%c0, %c0_0] : memref<8x32xf32, #tpu.memory_space<vmem>>, vector<8x32xf32>
    %c0_1 = arith.constant 0 : index
    %c0_2 = arith.constant 0 : index
    %1 = vector.load %arg4[%c0_1, %c0_2] : memref<32x128xf32, #tpu.memory_space<vmem>>, vector<32x128xf32>
    %cst = arith.constant dense<0.000000e+00> : vector<8x128xf32>
    %2 = tpu.matmul %0, %1, %cst {dimension_numbers = #tpu.dot_dimension_numbers<[1], [0], [0], [1], [0, 0, 1, 1], [], []>} : vector<8x32xf32>, vector<32x128xf32>, vector<8x128xf32> -> vector<8x128xf32>
    %c0_3 = arith.constant 0 : index
    %c0_4 = arith.constant 0 : index
    %3 = vector.load %arg2[%c0_3, %c0_4] : memref<8x128xf32, #tpu.memory_space<vmem>>, vector<8x128xf32>
    %4 = arith.mulf %3, %2 : vector<8x128xf32>
    %c0_5 = arith.constant 0 : index
    %c0_6 = arith.constant 0 : index
    %5 = vector.load %arg5[%c0_5, %c0_6] : memref<128x8xf32, #tpu.memory_space<vmem>>, vector<128x8xf32>
    %cst_7 = arith.constant dense<0.000000e+00> : vector<8x8xf32>
    %6 = tpu.matmul %4, %5, %cst_7 {dimension_numbers = #tpu.dot_dimension_numbers<[1], [0], [0], [1], [0, 0, 1, 1], [], []>} : vector<8x128xf32>, vector<128x8xf32>, vector<8x8xf32> -> vector<8x8xf32>
    %7 = tpu.iota {dimensions = array<i32: 1>} : vector<8x8xi32>
    %c0_8 = arith.constant 0 : index
    %c0_9 = arith.constant 0 : index
    %8 = vector.load %arg3[%c0_8, %c0_9] : memref<8x1xi32, #tpu.memory_space<vmem>>, vector<8x1xi32>
    %9 = vector.broadcast %8 : vector<8x1xi32> to vector<8x8xi32>
    %10 = arith.cmpi slt, %7, %9 : vector<8x8xi32>
    %cst_10 = arith.constant -4.2949673E+9 : f32
    %11 = vector.broadcast %cst_10 : f32 to vector<8x8xf32>
    %12 = arith.select %10, %6, %11 : vector<8x8xi1>, vector<8x8xf32>
    %13 = tpu.transpose %12, [1, 0] : vector<8x8xf32> -> vector<8x8xf32>
    %cst_11 = arith.constant dense<0xFF800000> : vector<8xf32>
    %14 = vector.multi_reduction <maximumf>, %13, %cst_11 [0] : vector<8x8xf32> to vector<8xf32>
    %15 = vector.shape_cast %14 : vector<8xf32> to vector<1x8xf32>
    %16 = vector.broadcast %15 : vector<1x8xf32> to vector<8x8xf32>
    %17 = arith.subf %13, %16 : vector<8x8xf32>
    %18 = math.exp %17 : vector<8x8xf32>
    %cst_12 = arith.constant dense<0.000000e+00> : vector<8xf32>
    %19 = vector.multi_reduction <add>, %18, %cst_12 [0] : vector<8x8xf32> to vector<8xf32>
    %20 = vector.shape_cast %19 : vector<8xf32> to vector<1x8xf32>
    %21 = tpu.reciprocal %20 : vector<1x8xf32> -> vector<1x8xf32>
    %22 = vector.broadcast %21 : vector<1x8xf32> to vector<8x8xf32>
    %23 = arith.mulf %18, %22 : vector<8x8xf32>
    %c0_13 = arith.constant 0 : index
    %c0_14 = arith.constant 0 : index
    %c0_15 = arith.constant 0 : index
    %24 = vector.load %arg6[%c0_13, %c0_14, %c0_15] : memref<1x8x8xf32, #tpu.memory_space<vmem>>, vector<1x8x8xf32>
    %25 = vector.shape_cast %24 : vector<1x8x8xf32> to vector<8x8xf32>
    %26 = vector.shape_cast %23 : vector<8x8xf32> to vector<1x8x8xf32>
    tpu.vector_store %arg6[%c0_13, %c0_14, %c0_15], %26 {strides = array<i32>} : memref<1x8x8xf32, #tpu.memory_space<vmem>>, vector<1x8x8xf32>,
    return
  }
  func.func @transform_0(%arg0: i32) -> (i32, i32) {
    %c0_i32 = arith.constant 0 : i32
    %c0_i32_0 = arith.constant 0 : i32
    return %arg0, %c0_i32 : i32, i32
  }
  func.func @transform_1(%arg0: i32) -> (i32, i32) {
    %c0_i32 = arith.constant 0 : i32
    %c0_i32_0 = arith.constant 0 : i32
    return %arg0, %c0_i32 : i32, i32
  }
  func.func @transform_2(%arg0: i32) -> (i32, i32) {
    %c0_i32 = arith.constant 0 : i32
    %c0_i32_0 = arith.constant 0 : i32
    return %arg0, %c0_i32 : i32, i32
  }
  func.func @transform_3(%arg0: i32) -> (i32, i32) {
    %c0_i32 = arith.constant 0 : i32
    %c0_i32_0 = arith.constant 0 : i32
    %c0_i32_1 = arith.constant 0 : i32
    return %c0_i32, %c0_i32_0 : i32, i32
  }
  func.func @transform_4(%arg0: i32) -> (i32, i32) {
    %c0_i32 = arith.constant 0 : i32
    %c0_i32_0 = arith.constant 0 : i32
    %c0_i32_1 = arith.constant 0 : i32
    return %c0_i32, %c0_i32_0 : i32, i32
  }
  func.func @transform_5(%arg0: i32) -> (i32, i32, i32) {
    %c0_i32 = arith.constant 0 : i32
    %c0_i32_0 = arith.constant 0 : i32
    %c0_i32_1 = arith.constant 0 : i32
    return %arg0, %c0_i32, %c0_i32_0 : i32, i32, i32
  }
}

</mosaic_0001>

<bundles_post_ra>
// kernel: tpu_custom_call.1
= control target key start
LH: loop header
LB: loop body
LE: loop exit
PB: predicated region body
PF: predicated region fallthrough
CT: control target
= control target key end

     0   :  { %v363_v1 = vmov 0.0   ;;  %vm364_vm0 = vmmov 0   ;;  %vm26_vm1 = vcmask 261120   ;;  %s496_s0 = inlined_call_operand.vmem [shape: f32[8,32], index: 0, kind: input, shape index: {}]   ;;  %s497_s1 = inlined_call_operand.vmem [shape: f32[8,128], index: 1, kind: input, shape index: {}]   ;;  %s498_s2 = inlined_call_operand.vmem [shape: s32[8,1], index: 2, kind: input, shape index: {}]   ;;  %s499_s3 = inlined_call_operand.vmem [shape: f32[32,128], index: 3, kind: input, shape index: {}]   ;;  %s500_s4 = inlined_call_operand.vmem [shape: f32[128,8], index: 4, kind: input, shape index: {}]   ;;  %s501_s5 = inlined_call_operand.hbm [shape: f32[1,8,8], index: 5, kind: output, shape index: {}]  }
   0x1   :  { %v25_v0 = vld [vmem:[%s499_s3 + $0x18] sm:$0xff]  ;;  %286 = vmatprep.subr.mxu0 %v363_v1  ;;  %v24_v2 = vld [vmem:[%s499_s3 + $0x10] sm:$0xff]  ;;  %294 = vmatprep.mubr.msk.f32.mxu0 %vm364_vm0, %v363_v1  ;;  %v23_v5 = vld [vmem:[%s499_s3 + $0x8] sm:$0xff] }
   0x2   :  { %v117_v3 = vld [vmem:[%s500_s4 + $0x78] sm:$0xff]  ;;  %287 = vmatpush3.msra.mxu0 %v25_v0  ;;  %297 = vmatprep.subr.mxu1 %v363_v1  ;;  %v116_v4 = vld [vmem:[%s500_s4 + $0x70] sm:$0xff]  ;;  %v115_v6 = vld [vmem:[%s500_s4 + $0x68] sm:$0xff] }
   0x3   :  { %288 = vmatprep.subr.mxu0 %v363_v1  ;;  %298 = vmatpush3.msra.mxu1 %v117_v3  ;;  %v22_v7 = vld [vmem:[%s499_s3] sm:$0xff] }
   0x4   :  { %289 = vmatpush3.msra.mxu0 %v24_v2  ;;  %299 = vmatprep.subr.mxu1 %v363_v1  ;;  %v21_v8 = vld [vmem:[%s496_s0] sm:$0xff] }
   0x5   :  { %290 = vmatprep.subr.mxu0 %v363_v1  ;;  %300 = vmatpush3.msra.mxu1 %v116_v4  ;;  %v114_v9 = vld [vmem:[%s500_s4 + $0x60] sm:$0xff] }
   0x6   :  { %291 = vmatpush3.msra.mxu0 %v23_v5  ;;  %301 = vmatprep.subr.mxu1 %v363_v1 }
   0x7   :  { %10 = vsyncpa [#allocation3], 0  ;;  %292 = vmatprep.subr.mxu0 %v363_v1  ;;  %302 = vmatpush3.msra.mxu1 %v115_v6  ;;  %v113_v10 = vld [vmem:[%s500_s4 + $0x58] sm:$0xff]  ;;  %v112_v11 = vld [vmem:[%s500_s4 + $0x50] sm:$0xff]  ;;  %v365_v23 = vmov 0   ;;  %v188_v28 = vlaneseq  ;;  %vm228_vm3 = vcmask 64512  }
   0x8   :  { %293 = vmatpush3.msra.mxu0 %v22_v7  ;;  %303 = vmatprep.subr.mxu1 %v363_v1  ;;  %v111_v12 = vld [vmem:[%s500_s4 + $0x48] sm:$0xff]  ;;  %v110_v13 = vld [vmem:[%s500_s4 + $0x40] sm:$0xff]  ;;  %v109_v14 = vld [vmem:[%s500_s4 + $0x38] sm:$0xff] }
   0x9   :  { %295 = vmatmul.mubr.msk.f32.vlgmr.msra.gmra.mxu0 %vm26_vm1, %v21_v8  ;;  %304 = vmatpush3.msra.mxu1 %v114_v9  ;;  %v108_v15 = vld [vmem:[%s500_s4 + $0x30] sm:$0xff]  ;;  %v107_v16 = vld [vmem:[%s500_s4 + $0x28] sm:$0xff]  ;;  %v106_v17 = vld [vmem:[%s500_s4 + $0x20] sm:$0xff]  ;;  %v189_v29 = vand.u32 127, %v188_v28 }
   0xa   :  { %305 = vmatprep.subr.mxu1 %v363_v1  ;;  %329 = vmatprep.mubr.msk.f32.mxu1 %vm364_vm0, %v363_v1  ;;  %v105_v18 = vld [vmem:[%s500_s4 + $0x18] sm:$0xff]  ;;  %v104_v19 = vld [vmem:[%s500_s4 + $0x10] sm:$0xff]  ;;  %v103_v20 = vld [vmem:[%s500_s4 + $0x8] sm:$0xff] }
   0xb   :  { %306 = vmatpush3.msra.mxu1 %v113_v10  ;;  %v102_v21 = vld [vmem:[%s500_s4] sm:$0xff]  ;;  %336 = vset.pattern.permute.xlu0 %v365_v23 }
   0xc   :  { %307 = vmatprep.subr.mxu1 %v363_v1  ;;  %v190_v22 = vld [vmem:[%s498_s2] sm:$0xff] }
   0xd   :  { %308 = vmatpush3.msra.mxu1 %v112_v11  ;;  %192 = vperm.xlu0 %336, %v190_v22   ;;  %v100_v24 = vld [vmem:[%s497_s1] sm:$0xff]  ;;  %s366_s1 = smov [#allocation2]  }
   0xe   :  { %309 = vmatprep.subr.mxu1 %v363_v1  ;;  %s255_s2 = sshll.u32 %s366_s1, 4  ;;  %s256_s2 = int_to_ptr.vmem [resolvable:$true] %s255_s2 }
   0xf   :  { %310 = vmatpush3.msra.mxu1 %v111_v12  ;;  %s341_s4 = scalar_lea.vmem %s256_s2, 128  ;;  %p346_p1 = scmp.lt.s32.totalorder %s256_s2, %s256_s2 }
  0x10   :  { %311 = vmatprep.subr.mxu1 %v363_v1  ;;  %p342_p0 = scmp.ne.s32.totalorder %s256_s2, %s341_s4  ;;  %p347_p2 = scmp.lt.s32.totalorder %s341_s4, %s341_s4 }
  0x11   :  { %312 = vmatpush3.msra.mxu1 %v110_v13 }
  0x12   :  { %313 = vmatprep.subr.mxu1 %v363_v1  ;;  %p348_p3 = por %p347_p2, %p346_p1 }
  0x13   :  { %314 = vmatpush3.msra.mxu1 %v109_v14 }
  0x14   :  { %315 = vmatprep.subr.mxu1 %v363_v1  ;;  %p349_p4 = pnand %p348_p3, %p342_p0 }
  0x15   :  { %316 = vmatpush3.msra.mxu1 %v108_v15 }
  0x16   :  { %317 = vmatprep.subr.mxu1 %v363_v1 }
  0x17   :  { %318 = vmatpush3.msra.mxu1 %v107_v16 }
  0x18   :  { %319 = vmatprep.subr.mxu1 %v363_v1 }
  0x19   :  { %320 = vmatpush3.msra.mxu1 %v106_v17 }
  0x1a   :  { %321 = vmatprep.subr.mxu1 %v363_v1 }
  0x1b   :  { %322 = vmatpush3.msra.mxu1 %v105_v18 }
  0x1c   :  { %323 = vmatprep.subr.mxu1 %v363_v1 }
  0x1d   :  { %324 = vmatpush3.msra.mxu1 %v104_v19 }
  0x1e   :  { %325 = vmatprep.subr.mxu1 %v363_v1 }
  0x1f   :  { %326 = vmatpush3.msra.mxu1 %v103_v20 }
  0x20   :  { %327 = vmatprep.subr.mxu1 %v363_v1 }
  0x21   :  { %328 = vmatpush3.msra.mxu1 %v102_v21 }
  0x88   :  { %v193_v30 = vpop.permute.xlu0 %192 }
  0x89   :  { %vm194_vm2 = vcmp.lt.s32.totalorder %v189_v29, %v193_v30 }
  0xc9   :  { %v96_v25 = vpop.f32.mrf.mxu0 }
  0xca   :  { %v101_v26 = vmul.f32 %v100_v24, %v96_v25 }
  0xcb   :  { %v296_v27 = vpop.f32.mrf.mxu0 }
  0xcc   :  { %330 = vmatmul.mubr.f32.vlgmr.msra.gmra.mxu1 %v101_v26 }
 0x18c   :  { %v184_v31 = vpop.f32.mrf.mxu1 }
 0x18d   :  { %v195_v32 = vsel %vm194_vm2, %v184_v31, -4.2949673e+09 }
 0x18e   :  { %196 = vxpose.xlu0.b32.start.end [1/1] (short) (narrow) %v195_v32, 8  ;;  %v331_v33 = vpop.f32.mrf.mxu1 }
 0x20a   :  { %v212_v34 = vpop.trf.xlu0 }
 0x20b   :  { %v229_v35 = vsel %vm228_vm3, %v212_v34, -inf }
 0x20c   :  { %v230_v36 = vrot.slane %v229_v35, 4 }
 0x20e   :  { %v231_v37 = vmax.f32 %v229_v35, %v230_v36 }
 0x210   :  { %v232_v38 = vrot.slane %v231_v37, 2 }
 0x212   :  { %v233_v39 = vmax.f32 %v231_v37, %v232_v38 }
 0x214   :  { %v234_v40 = vrot.slane %v233_v39, 1 }
 0x216   :  { %v235_v41 = vmax.f32 %v233_v39, %v234_v40 }
 0x218   :  { %v236_v42 = vsub.f32 %v212_v34, %v235_v41 }
 0x21a   :  { %v237_v43 = vmul.f32 1.442695, %v236_v42 }
 0x21c   :  { %337 = vpow2.f32 %v237_v43 }
 0x229   :  { %v338_v44 = vpop.eup %337 }
 0x22a   :  { %v239_v45 = vsel %vm228_vm3, %v338_v44, 0.0 }
 0x22b   :  { %v240_v46 = vrot.slane %v239_v45, 4 }
 0x22d   :  { %v241_v47 = vadd.f32 %v240_v46, %v239_v45 }
 0x22f   :  { %v242_v48 = vrot.slane %v241_v47, 2 }
 0x231   :  { %v243_v49 = vadd.f32 %v242_v48, %v241_v47 }
 0x233   :  { %v244_v50 = vrot.slane %v243_v49, 1 }
 0x235   :  { %v245_v51 = vadd.f32 %v244_v50, %v243_v49 }
 0x237   :  { %339 = vrcp.f32 %v245_v51 }
 0x244   :  { %v340_v52 = vpop.eup %339 }
 0x245   :  { %v247_v53 = vmul.f32 %v340_v52, %v338_v44 }
 0x247   :  { %248 = vst.msk [vmem:[#allocation2] sm:$0xff] %vm228_vm3, %v247_v53 }
 0x248   :  { %352 = shalt.err (!%p349_p4)
}
 0x249   :  { %258 = dma.vmem_to_hbm [thread:$0]  %s256_s2, 128, %s501_s5, [#allocation3]  }
 0x24a   :  { %361 = dma.done.wait [#allocation3], 128  }
 0x24b   :  { %362 = vsyncadd [#allocation3], 4294967168 }
 0x24c   :  { %262 = vsyncpa [#allocation3], 1 }

</bundles_post_ra>
